<compile_context>
chip_gen: v7x
topology: tpu7x:2x2x1
jax: 0.10.0
libtpu: 0.0.40
codegen_flags: <defaults>
</compile_context>

<pallas_src>
import jax
import jax.numpy as jnp
from jax.experimental import pallas as pl
from jax.experimental.pallas import tpu as pltpu


_TARGET_BLOCK_BYTES = 2 * 1024 * 1024  # per input, per pipeline buffer (f32)


def _cdiv(a, b):
    return (a + b - 1) // b


def _round_up(a, m):
    return _cdiv(a, m) * m


def _make_dice_partials_kernel(tr, lane, rows, ragged):
    def kernel(x_ref, t_ref, o_ref):
        # x_ref, t_ref : (tr, lane) input tiles
        # o_ref        : (1, 3, lane) f32 lane-partial sums [x*t, x*x, t*t]
        x = x_ref[...].astype(jnp.float32)
        t = t_ref[...].astype(jnp.float32)
        if ragged:
            # The last grid step sees a partial block; Pallas pads it with
            # unspecified values, so zero them before the products.
            valid = rows - pl.program_id(0) * tr      # >= tr except last block
            row_ids = jax.lax.broadcasted_iota(jnp.int32, (tr, lane), 0)
            keep = row_ids < valid
            x = jnp.where(keep, x, 0.0)
            t = jnp.where(keep, t, 0.0)
        o_ref[0, 0:1, :] = jnp.sum(x * t, axis=0, keepdims=True)
        o_ref[0, 1:2, :] = jnp.sum(x * x, axis=0, keepdims=True)
        o_ref[0, 2:3, :] = jnp.sum(t * t, axis=0, keepdims=True)
    return kernel


def soft_bootstrapped_dice_loss(inp, tgt, beta=0.9):
    """Pallas TPU implementation of SoftBootstrappedDiceLoss.forward."""
    assert inp.shape == tgt.shape
    n = int(inp.size)

    xf = jnp.reshape(inp, (-1,))
    tf = jnp.reshape(tgt, (-1,))

    # Lane-dense width: largest multiple of 128 dividing N -> no padding copy.
    lane = None
    for cand in (1024, 512, 256, 128):
        if n % cand == 0:
            lane = cand
            break
    if lane is None:
        # TODO(synk): N not a multiple of 128.  A fully copy-free path would
        # need a 1-D / manual-DMA tail kernel; here we pad the tail once to the
        # next multiple of 128 (zeros contribute 0 to every partial sum).
        pad = (-n) % 128
        xf = jnp.pad(xf, (0, pad))
        tf = jnp.pad(tf, (0, pad))
        lane = 128
        for cand in (1024, 512, 256):
            if xf.size % cand == 0:
                lane = cand
                break

    rows = xf.size // lane
    x2 = xf.reshape(rows, lane)
    t2 = tf.reshape(rows, lane)

    # Sublane multiple required by the input dtype ((8,128) f32, (16,128) bf16).
    sub = max(8, 32 // max(1, jnp.dtype(inp.dtype).itemsize))

    # Row tile: constant ~2 MiB byte budget per input per buffer.
    tr = max(sub, (_TARGET_BLOCK_BYTES // (4 * lane)) // sub * sub)
    if rows <= tr:
        if rows > sub:
            # Split a would-be single block in two so both v7x TensorCores
            # (the "parallel" grid axis) have work.
            tr = min(_round_up(_cdiv(rows, 2), sub), rows)
        else:
            tr = rows                  # tiny input: one full-extent block

    num_blocks = _cdiv(rows, tr)
    ragged = (rows % tr) != 0          # last block partial -> mask in-kernel

    kernel = _make_dice_partials_kernel(tr, lane, rows, ragged)

    parts = pl.pallas_call(
        kernel,
        out_shape=jax.ShapeDtypeStruct((num_blocks, 3, lane), jnp.float32),
        grid_spec=pltpu.PrefetchScalarGridSpec(
            num_scalar_prefetch=0,
            grid=(num_blocks,),
            in_specs=[pl.BlockSpec((tr, lane), lambda i: (i, 0)),
                      pl.BlockSpec((tr, lane), lambda i: (i, 0))],
            out_specs=pl.BlockSpec((1, 3, lane), lambda i: (i, 0, 0)),
        ),
        compiler_params=pltpu.CompilerParams(
            dimension_semantics=("parallel",)),
    )(x2, t2)

    # Tiny scalar combine over a few KiB of partials (plain JAX glue).
    s = jnp.sum(parts, axis=(0, 2))                # [sum x*t, sum x*x, sum t*t]
    s_xt, s_xx, s_tt = s[0], s[1], s[2]
    num = beta * s_xt + (1.0 - beta) * s_xx        # == sum(input * comb)
    den = s_xx + s_tt                              # == sum(input^2 + target^2)
    return 1.0 - (1.0 + 2.0 * num) / (1.0 + den)


def _reference(inp, tgt, beta):
    inp = inp.astype(jnp.float32)
    tgt = tgt.astype(jnp.float32)
    comb = beta * tgt + (1.0 - beta) * inp
    return 1.0 - (1.0 + 2.0 * jnp.sum(inp * comb)) / (
        1.0 + jnp.sum(inp * inp + tgt * tgt))


if __name__ == "__main__":
    key = jax.random.PRNGKey(0)
    beta = 0.9

    shapes = [
        (2, 4, 16, 16),   # N % 128 == 0 : pad-free fast path
        (2, 4, 12, 12),   # rows % tr != 0 : in-kernel masked partial last block
        (3, 5, 7, 9),     # N % 128 != 0 : tail-pad fallback path
    ]
    for shp in shapes:
        k1, k2, key = jax.random.split(key, 3)
        inp = jax.nn.sigmoid(jax.random.normal(k1, shp, dtype=jnp.float32))
        tgt = (jax.random.uniform(k2, shp) > 0.5).astype(jnp.float32)

        out = jax.block_until_ready(
            soft_bootstrapped_dice_loss(inp, tgt, beta=beta))
        ref = _reference(inp, tgt, beta)

        assert out.shape == ()
        assert jnp.allclose(out, ref, atol=1e-5, rtol=1e-5), (shp, out, ref)

    print("KERNEL_OK")
</pallas_src>

<mosaic_0001>
module attributes {stable_mosaic.version = 11 : i64} {
  func.func @kernel(%arg0: i32, %arg1: memref<2x1024xf32, #tpu.memory_space<vmem>>, %arg2: memref<2x1024xf32, #tpu.memory_space<vmem>>, %arg3: memref<1x3x1024xf32, #tpu.memory_space<vmem>>) attributes {dimension_semantics = [#tpu.dimension_semantics<parallel>], iteration_bounds = array<i64: 1>, scalar_prefetch = 0 : i64, scratch_operands = 0 : i64, tpu.core_type = #tpu.core_type<tc>, window_params = [{transform_indices = @transform_0, window_bounds = array<i64: 2, 1024>}, {transform_indices = @transform_1, window_bounds = array<i64: 2, 1024>}, {transform_indices = @transform_2, window_bounds = array<i64: 1, 3, 1024>}]} {
    %c0 = arith.constant 0 : index
    %c0_0 = arith.constant 0 : index
    %0 = vector.load %arg1[%c0, %c0_0] : memref<2x1024xf32, #tpu.memory_space<vmem>>, vector<2x1024xf32>
    %c0_1 = arith.constant 0 : index
    %c0_2 = arith.constant 0 : index
    %1 = vector.load %arg2[%c0_1, %c0_2] : memref<2x1024xf32, #tpu.memory_space<vmem>>, vector<2x1024xf32>
    %2 = arith.mulf %0, %1 : vector<2x1024xf32>
    %cst = arith.constant dense<0.000000e+00> : vector<1024xf32>
    %3 = vector.multi_reduction <add>, %2, %cst [0] : vector<2x1024xf32> to vector<1024xf32>
    %4 = vector.shape_cast %3 : vector<1024xf32> to vector<1x1024xf32>
    %c0_3 = arith.constant 0 : index
    %c0_4 = arith.constant 0 : index
    %c0_5 = arith.constant 0 : index
    %5 = vector.load %arg3[%c0_3, %c0_4, %c0_5] : memref<1x3x1024xf32, #tpu.memory_space<vmem>>, vector<1x1x1024xf32>
    %6 = vector.shape_cast %5 : vector<1x1x1024xf32> to vector<1x1024xf32>
    %7 = vector.shape_cast %4 : vector<1x1024xf32> to vector<1x1x1024xf32>
    tpu.vector_store %arg3[%c0_3, %c0_4, %c0_5], %7 {strides = array<i32>} : memref<1x3x1024xf32, #tpu.memory_space<vmem>>, vector<1x1x1024xf32>,
    %8 = arith.mulf %0, %0 : vector<2x1024xf32>
    %cst_6 = arith.constant dense<0.000000e+00> : vector<1024xf32>
    %9 = vector.multi_reduction <add>, %8, %cst_6 [0] : vector<2x1024xf32> to vector<1024xf32>
    %10 = vector.shape_cast %9 : vector<1024xf32> to vector<1x1024xf32>
    %c0_7 = arith.constant 0 : index
    %c1 = arith.constant 1 : index
    %c0_8 = arith.constant 0 : index
    %11 = vector.load %arg3[%c0_7, %c1, %c0_8] : memref<1x3x1024xf32, #tpu.memory_space<vmem>>, vector<1x1x1024xf32>
    %12 = vector.shape_cast %11 : vector<1x1x1024xf32> to vector<1x1024xf32>
    %13 = vector.shape_cast %10 : vector<1x1024xf32> to vector<1x1x1024xf32>
    tpu.vector_store %arg3[%c0_7, %c1, %c0_8], %13 {strides = array<i32>} : memref<1x3x1024xf32, #tpu.memory_space<vmem>>, vector<1x1x1024xf32>,
    %14 = arith.mulf %1, %1 : vector<2x1024xf32>
    %cst_9 = arith.constant dense<0.000000e+00> : vector<1024xf32>
    %15 = vector.multi_reduction <add>, %14, %cst_9 [0] : vector<2x1024xf32> to vector<1024xf32>
    %16 = vector.shape_cast %15 : vector<1024xf32> to vector<1x1024xf32>
    %c0_10 = arith.constant 0 : index
    %c2 = arith.constant 2 : index
    %c0_11 = arith.constant 0 : index
    %17 = vector.load %arg3[%c0_10, %c2, %c0_11] : memref<1x3x1024xf32, #tpu.memory_space<vmem>>, vector<1x1x1024xf32>
    %18 = vector.shape_cast %17 : vector<1x1x1024xf32> to vector<1x1024xf32>
    %19 = vector.shape_cast %16 : vector<1x1024xf32> to vector<1x1x1024xf32>
    tpu.vector_store %arg3[%c0_10, %c2, %c0_11], %19 {strides = array<i32>} : memref<1x3x1024xf32, #tpu.memory_space<vmem>>, vector<1x1x1024xf32>,
    return
  }
  func.func @transform_0(%arg0: i32) -> (i32, i32) {
    %c0_i32 = arith.constant 0 : i32
    %c0_i32_0 = arith.constant 0 : i32
    return %arg0, %c0_i32 : i32, i32
  }
  func.func @transform_1(%arg0: i32) -> (i32, i32) {
    %c0_i32 = arith.constant 0 : i32
    %c0_i32_0 = arith.constant 0 : i32
    return %arg0, %c0_i32 : i32, i32
  }
  func.func @transform_2(%arg0: i32) -> (i32, i32, i32) {
    %c0_i32 = arith.constant 0 : i32
    %c0_i32_0 = arith.constant 0 : i32
    %c0_i32_1 = arith.constant 0 : i32
    return %arg0, %c0_i32, %c0_i32_0 : i32, i32, i32
  }
}

</mosaic_0001>

<bundles_post_ra>
// kernel: tpu_custom_call.1
= control target key start
LH: loop header
LB: loop body
LE: loop exit
PB: predicated region body
PF: predicated region fallthrough
CT: control target
= control target key end

     0   :  { %7 = vsyncpa [#allocation3], 0  ;;  %s728_s0 = inlined_call_operand.hbm [shape: f32[2,1024], index: 0, kind: input, shape index: {}]   ;;  %s729_s1 = inlined_call_operand.hbm [shape: f32[2,1024], index: 1, kind: input, shape index: {}]   ;;  %s730_s2 = inlined_call_operand.vmem [shape: f32[1,3,1024], index: 2, kind: output, shape index: {}]  }
   0x1   :  { %8 = vsyncpa [#allocation5], 0  ;;  %s585_s9 = smov [#allocation2]   ;;  %s586_s11 = smov [#allocation4]  }
   0x2   :  { %s15_s10 = sshll.u32 %s585_s9, 4  ;;  %s25_s12 = sshll.u32 %s586_s11, 4  ;;  %s16_s10 = int_to_ptr.vmem [resolvable:$true] %s15_s10  ;;  %s26_s12 = int_to_ptr.vmem [resolvable:$true] %s25_s12 }
   0x3   :  { %s537_s15 = scalar_lea.hbm %s728_s0, 256 }
   0x4   :  { %p538_p0 = scmp.ne.s32.totalorder %s728_s0, %s537_s15  ;;  %p541_p1 = scmp.lt.u32.totalorder %s537_s15, %s728_s0 }
   0x6   :  { %p543_p2 = pnand %p541_p1, %p538_p0 }
   0x8   :  { %546 = shalt.err (!%p543_p2)
}
   0x9   :  { %s547_s20 = scalar_lea.vmem %s16_s10, 256  ;;  %p552_p4 = scmp.lt.s32.totalorder %s16_s10, %s16_s10 }
   0xa   :  { %p548_p3 = scmp.ne.s32.totalorder %s16_s10, %s547_s20  ;;  %p553_p5 = scmp.lt.s32.totalorder %s547_s20, %s547_s20 }
   0xc   :  { %p554_p6 = por %p553_p5, %p552_p4 }
   0xe   :  { %p555_p7 = pnand %p554_p6, %p548_p3 }
  0x10   :  { %558 = shalt.err (!%p555_p7)
}
  0x11   :  { %18 = dma.hbm_to_vmem [thread:$0]  %s728_s0, 256, %s16_s10, [#allocation3]  }
  0x12   :  { %s559_s25 = scalar_lea.hbm %s729_s1, 256 }
  0x13   :  { %p560_p8 = scmp.ne.s32.totalorder %s729_s1, %s559_s25  ;;  %p563_p9 = scmp.lt.u32.totalorder %s559_s25, %s729_s1 }
  0x15   :  { %p565_p10 = pnand %p563_p9, %p560_p8 }
  0x17   :  { %568 = shalt.err (!%p565_p10)
}
  0x18   :  { %s569_s30 = scalar_lea.vmem %s26_s12, 256  ;;  %p574_p12 = scmp.lt.s32.totalorder %s26_s12, %s26_s12 }
  0x19   :  { %p570_p11 = scmp.ne.s32.totalorder %s26_s12, %s569_s30  ;;  %p575_p13 = scmp.lt.s32.totalorder %s569_s30, %s569_s30 }
  0x1b   :  { %p576_p0 = por %p575_p13, %p574_p12 }
  0x1d   :  { %p577_p1 = pnand %p576_p0, %p570_p11 }
  0x1f   :  { %580 = shalt.err (!%p577_p1)
}
  0x20   :  { %28 = dma.hbm_to_vmem [thread:$0]  %s729_s1, 256, %s26_s12, [#allocation5]  }
  0x21   :  { %581 = dma.done.wait [#allocation3], 256  }
  0x22   :  { %582 = vsyncadd [#allocation3], 4294967040 }
  0x23   :  { %583 = dma.done.wait [#allocation5], 256  }
  0x24   :  { %584 = vsyncadd [#allocation5], 4294967040  ;;  %v47_v0 = vlaneseq  ;;  %v587_v1 = vmov 1983009808   ;;  %v588_v4 = vmov 1966171168  }
  0x25   :  { %v45_v2 = vunpack.c.l.s4 %v587_v1  ;;  %v155_v5 = vunpack.c.l.s4 %v588_v4  ;;  %v35_v9 = vld [vmem:[#allocation2] sm:$0xff]  ;;  %v36_v10 = vld [vmem:[#allocation2 + $0x8] sm:$0xff]  ;;  %v37_v11 = vld [vmem:[#allocation4] sm:$0xff]  ;;  %vm85_vm0 = vcmask 1041408  }
  0x26   :  { %v48_v3 = vshrl.u32 %v47_v0, 7  ;;  %v38_v12 = vld [vmem:[#allocation4 + $0x8] sm:$0xff]  ;;  %v39_v13 = vmul.f32 %v37_v11, %v35_v9  ;;  %v201_v14 = vmul.f32 %v35_v9, %v35_v9  ;;  %v630_v15 = vmul.f32 %v36_v10, %v36_v10 }
  0x27   :  { %v46_v6 = vunpack.c.0.s8 %v45_v2  ;;  %v156_v7 = vunpack.c.0.s8 %v155_v5  ;;  %v40_v16 = vmul.f32 %v38_v12, %v36_v10  ;;  %v634_v18 = vmul.f32 %v37_v11, %v37_v11 }
  0x28   :  { %v636_v19 = vmul.f32 %v38_v12, %v38_v12  ;;  %v43_v20 = vcombine.high %v39_v13, %v39_v13  ;;  %v205_v22 = vcombine.high %v201_v14, %v201_v14  ;;  %v222_v26 = vcombine.high %v630_v15, %v630_v15 }
  0x29   :  { %v628_v8 = vsub.s32 %v46_v6, %v48_v3  ;;  %v632_v17 = vsub.s32 %v156_v7, %v48_v3  ;;  %v60_v24 = vcombine.high %v40_v16, %v40_v16 }
  0x2b   :  { %v50_v21 = vrot.slane %v39_v13, %v628_v8  ;;  %v640_v23 = vrot.slane %v201_v14, %v628_v8  ;;  %v67_v25 = vrot.slane %v40_v16, %v628_v8  ;;  %v647_v27 = vrot.slane %v630_v15, %v628_v8 }
  0x2c   :  { %v57_v28 = vrot.slane %v43_v20, %v628_v8  ;;  %v652_v31 = vrot.slane %v205_v22, %v628_v8  ;;  %v74_v32 = vrot.slane %v60_v24, %v628_v8 }
  0x2d   :  { %v58_v29 = vcombine.high %v50_v21, %v50_v21  ;;  %v86_v30 = vsel %vm85_vm0, %v50_v21, 0.0  ;;  %v75_v33 = vcombine.high %v67_v25, %v67_v25  ;;  %v114_v35 = vsel %vm85_vm0, %v67_v25, 0.0 }
  0x2e   :  { %v87_v34 = vrot.slane %v86_v30, 4  ;;  %v59_v36 = vcombine.high %v57_v28, %v57_v28  ;;  %v100_v38 = vsel %vm85_vm0, %v57_v28, 0.0  ;;  %v115_v39 = vrot.slane %v114_v35, 4 }
  0x2f   :  { %v93_v37 = vsel %vm85_vm0, %v58_v29, 0.0  ;;  %v76_v40 = vcombine.high %v74_v32, %v74_v32  ;;  %v101_v43 = vrot.slane %v100_v38, 4  ;;  %v121_v46 = vsel %vm85_vm0, %v75_v33, 0.0 }
  0x30   :  { %v88_v41 = vadd.f32 %v87_v34, %v86_v30  ;;  %v94_v42 = vrot.slane %v93_v37, 4  ;;  %v107_v44 = vsel %vm85_vm0, %v59_v36, 0.0  ;;  %v116_v45 = vadd.f32 %v115_v39, %v114_v35 }
  0x31   :  { %v128_v47 = vsel %vm85_vm0, %v74_v32, 0.0  ;;  %v102_v50 = vadd.f32 %v101_v43, %v100_v38  ;;  %v108_v51 = vrot.slane %v107_v44, 4  ;;  %v122_v53 = vrot.slane %v121_v46, 4 }
  0x32   :  { %v89_v48 = vrot.slane %v88_v41, 2  ;;  %v95_v49 = vadd.f32 %v94_v42, %v93_v37  ;;  %v117_v52 = vrot.slane %v116_v45, 2  ;;  %v129_v54 = vrot.slane %v128_v47, 4 }
  0x33   :  { %v135_v55 = vsel %vm85_vm0, %v76_v40, 0.0  ;;  %v103_v58 = vrot.slane %v102_v50, 2  ;;  %v109_v59 = vadd.f32 %v108_v51, %v107_v44  ;;  %v123_v61 = vadd.f32 %v122_v53, %v121_v46 }
  0x34   :  { %v90_v56 = vadd.f32 %v89_v48, %v88_v41  ;;  %v96_v57 = vrot.slane %v95_v49, 2  ;;  %v118_v60 = vadd.f32 %v117_v52, %v116_v45  ;;  %v130_v62 = vadd.f32 %v129_v54, %v128_v47 }
  0x35   :  { %v136_v63 = vrot.slane %v135_v55, 4  ;;  %v104_v2 = vadd.f32 %v103_v58, %v102_v50  ;;  %v110_v3 = vrot.slane %v109_v59, 2  ;;  %v124_v5 = vrot.slane %v123_v61, 2 }
  0x36   :  { %v91_v0 = vrot.slane %v90_v56, 1  ;;  %v97_v1 = vadd.f32 %v96_v57, %v95_v49  ;;  %v119_v4 = vrot.slane %v118_v60, 1  ;;  %v131_v6 = vrot.slane %v130_v62, 2 }
  0x37   :  { %v137_v7 = vadd.f32 %v136_v63, %v135_v55  ;;  %v105_v11 = vrot.slane %v104_v2, 1  ;;  %v111_v12 = vadd.f32 %v110_v3, %v109_v59  ;;  %v125_v14 = vadd.f32 %v124_v5, %v123_v61 }
  0x38   :  { %v92_v9 = vadd.f32 %v91_v0, %v90_v56  ;;  %v98_v10 = vrot.slane %v97_v1, 1  ;;  %v120_v13 = vadd.f32 %v119_v4, %v118_v60  ;;  %v132_v16 = vadd.f32 %v131_v6, %v130_v62 }
  0x39   :  { %v138_v20 = vrot.slane %v137_v7, 2  ;;  %v106_v22 = vadd.f32 %v105_v11, %v104_v2  ;;  %v112_v24 = vrot.slane %v111_v12, 1  ;;  %v220_v25 = vcombine.high %v640_v23, %v640_v23 }
  0x3a   :  { %v99_v21 = vadd.f32 %v98_v10, %v97_v1  ;;  %v126_v28 = vrot.slane %v125_v14, 1  ;;  %v133_v29 = vrot.slane %v132_v16, 1  ;;  %v221_v32 = vcombine.high %v652_v31, %v652_v31 }
  0x3b   :  { %v139_v30 = vadd.f32 %v138_v20, %v137_v7  ;;  %v113_v33 = vadd.f32 %v112_v24, %v111_v12  ;;  %v236_v35 = vrot.slane %v222_v26, %v628_v8  ;;  %v237_v36 = vcombine.high %v647_v27, %v647_v27 }
  0x3c   :  { %v150_v34 = vcombine.low %v92_v9, %v99_v21  ;;  %v127_v37 = vadd.f32 %v126_v28, %v125_v14  ;;  %v134_v38 = vadd.f32 %v133_v29, %v132_v16  ;;  %v247_v40 = vsel %vm85_vm0, %v640_v23, 0.0 }
  0x3d   :  { %v140_v39 = vrot.slane %v139_v30, 1  ;;  %v151_v41 = vcombine.low %v106_v22, %v113_v33  ;;  %v238_v43 = vcombine.high %v236_v35, %v236_v35  ;;  %v248_v44 = vrot.slane %v247_v40, 4 }
  0x3e   :  { %v160_v42 = vrot.slane %v150_v34, %v632_v17  ;;  %v152_v46 = vcombine.low %v120_v13, %v127_v37  ;;  %v254_v47 = vsel %vm85_vm0, %v220_v25, 0.0  ;;  %v261_v15 = vsel %vm85_vm0, %v652_v31, 0.0 }
  0x3f   :  { %v141_v45 = vadd.f32 %v140_v39, %v139_v30  ;;  %v167_v26 = vrot.slane %v151_v41, %v632_v17  ;;  %v249_v48 = vadd.f32 %v248_v44, %v247_v40  ;;  %v255_v49 = vrot.slane %v254_v47, 4 }
  0x40   :  { %v262_v50 = vrot.slane %v261_v15, 4  ;;  %v174_v23 = vrot.slane %v152_v46, %v632_v17  ;;  %v268_v52 = vsel %vm85_vm0, %v221_v32, 0.0  ;;  %v275_v53 = vsel %vm85_vm0, %v647_v27, 0.0 }
  0x41   :  { %v153_v51 = vcombine.low %v134_v38, %v141_v45  ;;  %v182_v54 = vcombine.low %v160_v42, %v167_v26  ;;  %v250_v55 = vrot.slane %v249_v48, 2  ;;  %v256_v56 = vadd.f32 %v255_v49, %v254_v47 }
  0x42   :  { %v263_v57 = vadd.f32 %v262_v50, %v261_v15  ;;  %v269_v31 = vrot.slane %v268_v52, 4  ;;  %v276_v59 = vrot.slane %v275_v53, 4  ;;  %v282_v60 = vsel %vm85_vm0, %v237_v36, 0.0 }
  0x43   :  { %v181_v58 = vrot.slane %v153_v51, %v632_v17  ;;  %v190_v61 = vrot.slane %v182_v54, %v632_v17  ;;  %v251_v62 = vadd.f32 %v250_v55, %v249_v48  ;;  %v257_v63 = vrot.slane %v256_v56, 2 }
  0x44   :  { %v264_v0 = vrot.slane %v263_v57, 2  ;;  %v270_v2 = vadd.f32 %v269_v31, %v268_v52  ;;  %v277_v3 = vadd.f32 %v276_v59, %v275_v53  ;;  %v283_v4 = vrot.slane %v282_v60, 4 }
  0x45   :  { %v183_v1 = vcombine.low %v174_v23, %v181_v58  ;;  %v252_v27 = vrot.slane %v251_v62, 1  ;;  %v258_v5 = vadd.f32 %v257_v63, %v256_v56  ;;  %v289_v7 = vsel %vm85_vm0, %v236_v35, 0.0 }
  0x46   :  { %v265_v6 = vadd.f32 %v264_v0, %v263_v57  ;;  %v271_v10 = vrot.slane %v270_v2, 2  ;;  %v278_v11 = vrot.slane %v277_v3, 2  ;;  %v284_v12 = vadd.f32 %v283_v4, %v282_v60 }
  0x47   :  { %v197_v9 = vrot.slane %v183_v1, %v632_v17  ;;  %v253_v13 = vadd.f32 %v252_v27, %v251_v62  ;;  %v259_v14 = vrot.slane %v258_v5, 1  ;;  %v290_v20 = vrot.slane %v289_v7, 4 }
  0x48   :  { %v266_v16 = vrot.slane %v265_v6, 1  ;;  %v272_v22 = vadd.f32 %v271_v10, %v270_v2  ;;  %v279_v24 = vadd.f32 %v278_v11, %v277_v3  ;;  %v285_v25 = vrot.slane %v284_v12, 2 }
  0x49   :  { %v198_v21 = vcombine.low %v190_v61, %v197_v9  ;;  %v260_v28 = vadd.f32 %v259_v14, %v258_v5  ;;  %v291_v30 = vadd.f32 %v290_v20, %v289_v7  ;;  %v296_v32 = vsel %vm85_vm0, %v238_v43, 0.0 }
  0x4a   :  { %v267_v29 = vadd.f32 %v266_v16, %v265_v6  ;;  %v273_v33 = vrot.slane %v272_v22, 1  ;;  %v280_v34 = vrot.slane %v279_v24, 1  ;;  %v286_v35 = vadd.f32 %v285_v25, %v284_v12 }
  0x4b   :  { %200 = vst [vmem:[%s730_s2] ss:$4 sm:$0xff] %v198_v21  ;;  %v297_v36 = vrot.slane %v296_v32, 4  ;;  %v292_v37 = vrot.slane %v291_v30, 2  ;;  %v311_v38 = vcombine.low %v253_v13, %v260_v28  ;;  %v367_v39 = vcombine.high %v634_v18, %v634_v18 }
  0x4c   :  { %v374_v40 = vrot.slane %v634_v18, %v628_v8  ;;  %v274_v41 = vadd.f32 %v273_v33, %v272_v22  ;;  %v281_v42 = vadd.f32 %v280_v34, %v279_v24  ;;  %v287_v44 = vrot.slane %v286_v35, 1 }
  0x4d   :  { %v298_v43 = vadd.f32 %v297_v36, %v296_v32  ;;  %v293_v45 = vadd.f32 %v292_v37, %v291_v30  ;;  %v321_v46 = vrot.slane %v311_v38, %v632_v17  ;;  %v381_v47 = vrot.slane %v367_v39, %v628_v8 }
  0x4e   :  { %v382_v15 = vcombine.high %v374_v40, %v374_v40  ;;  %v288_v26 = vadd.f32 %v287_v44, %v286_v35  ;;  %v312_v49 = vcombine.low %v267_v29, %v274_v41  ;;  %v384_v50 = vcombine.high %v636_v19, %v636_v19 }
  0x4f   :  { %v299_v48 = vrot.slane %v298_v43, 2  ;;  %v294_v51 = vrot.slane %v293_v45, 1  ;;  %v383_v23 = vcombine.high %v381_v47, %v381_v47  ;;  %v391_v18 = vrot.slane %v636_v19, %v628_v8 }
  0x50   :  { %v409_v52 = vsel %vm85_vm0, %v374_v40, 0.0  ;;  %v313_v54 = vcombine.low %v281_v42, %v288_v26  ;;  %v328_v55 = vrot.slane %v312_v49, %v632_v17  ;;  %v398_v56 = vrot.slane %v384_v50, %v628_v8 }
  0x51   :  { %v300_v53 = vadd.f32 %v299_v48, %v298_v43  ;;  %v295_v57 = vadd.f32 %v294_v51, %v293_v45  ;;  %v399_v58 = vcombine.high %v391_v18, %v391_v18  ;;  %v410_v31 = vrot.slane %v409_v52, 4 }
  0x52   :  { %v416_v59 = vsel %vm85_vm0, %v382_v15, 0.0  ;;  %v335_v61 = vrot.slane %v313_v54, %v632_v17  ;;  %v343_v62 = vcombine.low %v321_v46, %v328_v55  ;;  %v400_v63 = vcombine.high %v398_v56, %v398_v56 }
  0x53   :  { %v301_v60 = vrot.slane %v300_v53, 1  ;;  %v411_v0 = vadd.f32 %v410_v31, %v409_v52  ;;  %v417_v19 = vrot.slane %v416_v59, 4  ;;  %v423_v1 = vsel %vm85_vm0, %v381_v47, 0.0 }
  0x54   :  { %v430_v2 = vsel %vm85_vm0, %v383_v23, 0.0  ;;  %v351_v4 = vrot.slane %v343_v62, %v632_v17  ;;  %v424_v8 = vrot.slane %v423_v1, 4  ;;  %v437_v7 = vsel %vm85_vm0, %v391_v18, 0.0 }
  0x55   :  { %v302_v3 = vadd.f32 %v301_v60, %v300_v53  ;;  %v431_v27 = vrot.slane %v430_v2, 4  ;;  %v412_v5 = vrot.slane %v411_v0, 2  ;;  %v418_v6 = vadd.f32 %v417_v19, %v416_v59 }
  0x56   :  { %v444_v9 = vsel %vm85_vm0, %v399_v58, 0.0  ;;  %v425_v11 = vadd.f32 %v424_v8, %v423_v1  ;;  %v438_v13 = vrot.slane %v437_v7, 4  ;;  %v451_v21 = vsel %vm85_vm0, %v398_v56, 0.0 }
  0x57   :  { %v314_v10 = vcombine.low %v295_v57, %v302_v3  ;;  %v432_v12 = vadd.f32 %v431_v27, %v430_v2  ;;  %v413_v14 = vadd.f32 %v412_v5, %v411_v0  ;;  %v419_v16 = vrot.slane %v418_v6, 2 }
  0x58   :  { %v445_v20 = vrot.slane %v444_v9, 4  ;;  %v426_v24 = vrot.slane %v425_v11, 2  ;;  %v439_v28 = vadd.f32 %v438_v13, %v437_v7  ;;  %v452_v33 = vrot.slane %v451_v21, 4 }
  0x59   :  { %v342_v22 = vrot.slane %v314_v10, %v632_v17  ;;  %v433_v25 = vrot.slane %v432_v12, 2  ;;  %v414_v29 = vrot.slane %v413_v14, 1  ;;  %v420_v30 = vadd.f32 %v419_v16, %v418_v6 }
  0x5a   :  { %v446_v32 = vadd.f32 %v445_v20, %v444_v9  ;;  %v427_v35 = vadd.f32 %v426_v24, %v425_v11  ;;  %v440_v37 = vrot.slane %v439_v28, 2  ;;  %v453_v40 = vadd.f32 %v452_v33, %v451_v21 }
  0x5b   :  { %v344_v34 = vcombine.low %v335_v61, %v342_v22  ;;  %v434_v36 = vadd.f32 %v433_v25, %v432_v12  ;;  %v421_v38 = vrot.slane %v420_v30, 1  ;;  %v415_v45 = vadd.f32 %v414_v29, %v413_v14 }
  0x5c   :  { %v447_v39 = vrot.slane %v446_v32, 2  ;;  %v428_v42 = vrot.slane %v427_v35, 1  ;;  %v441_v43 = vadd.f32 %v440_v37, %v439_v28  ;;  %v454_v47 = vrot.slane %v453_v40, 2 }
  0x5d   :  { %v358_v41 = vrot.slane %v344_v34, %v632_v17  ;;  %v435_v44 = vrot.slane %v434_v36, 1  ;;  %v458_v15 = vsel %vm85_vm0, %v400_v63, 0.0  ;;  %v422_v48 = vadd.f32 %v421_v38, %v420_v30 }
  0x5e   :  { %v448_v46 = vadd.f32 %v447_v39, %v446_v32  ;;  %v429_v49 = vadd.f32 %v428_v42, %v427_v35  ;;  %v442_v50 = vrot.slane %v441_v43, 1  ;;  %v455_v18 = vadd.f32 %v454_v47, %v453_v40 }
  0x5f   :  { %v359_v26 = vcombine.low %v351_v4, %v358_v41  ;;  %v436_v51 = vadd.f32 %v435_v44, %v434_v36  ;;  %v459_v52 = vrot.slane %v458_v15, 4  ;;  %v473_v55 = vcombine.low %v415_v45, %v422_v48 }
  0x60   :  { %v449_v23 = vrot.slane %v448_v46, 1  ;;  %v443_v54 = vadd.f32 %v442_v50, %v441_v43  ;;  %v456_v57 = vrot.slane %v455_v18, 1 }
  0x61   :  { %531 = vst [vmem:[%s730_s2 + $0x1] ss:$4 sm:$0xff] %v359_v26  ;;  %v460_v53 = vadd.f32 %v459_v52, %v458_v15  ;;  %v474_v31 = vcombine.low %v429_v49, %v436_v51  ;;  %v483_v60 = vrot.slane %v473_v55, %v632_v17 }
  0x62   :  { %v450_v56 = vadd.f32 %v449_v23, %v448_v46  ;;  %v457_v61 = vadd.f32 %v456_v57, %v455_v18 }
  0x63   :  { %v461_v58 = vrot.slane %v460_v53, 2  ;;  %v490_v0 = vrot.slane %v474_v31, %v632_v17 }
  0x64   :  { %v475_v63 = vcombine.low %v443_v54, %v450_v56 }
  0x65   :  { %v462_v59 = vadd.f32 %v461_v58, %v460_v53  ;;  %v505_v3 = vcombine.low %v483_v60, %v490_v0 }
  0x66   :  { %v497_v2 = vrot.slane %v475_v63, %v632_v17 }
  0x67   :  { %v463_v62 = vrot.slane %v462_v59, 1  ;;  %v513_v27 = vrot.slane %v505_v3, %v632_v17 }
  0x69   :  { %v464_v19 = vadd.f32 %v463_v62, %v462_v59 }
  0x6b   :  { %v476_v1 = vcombine.low %v457_v61, %v464_v19 }
  0x6d   :  { %v504_v4 = vrot.slane %v476_v1, %v632_v17 }
  0x6f   :  { %v506_v8 = vcombine.low %v497_v2, %v504_v4 }
  0x71   :  { %v520_v5 = vrot.slane %v506_v8, %v632_v17 }
  0x73   :  { %v521_v6 = vcombine.low %v513_v27, %v520_v5 }
  0x75   :  { %532 = vst [vmem:[%s730_s2 + $0x2] ss:$4 sm:$0xff] %v521_v6 }
  0x76   :  { %529 = vsyncpa [#allocation3], 1 }
  0x77   :  { %530 = vsyncpa [#allocation5], 1 }

</bundles_post_ra>
